<compile_context>
chip_gen: v5e
topology: v5e:2x2
jax: 0.10.0
libtpu: 0.0.40
codegen_flags: <defaults>
</compile_context>

<pallas_src>
import functools
import math

import jax
import jax.numpy as jnp
from jax import lax
from jax.experimental import pallas as pl
from jax.experimental.pallas import tpu as pltpu

# bf16 weight tiles (<= ~16 MB each, double-buffered) fit comfortably under
# this on v5e/v6e (128 MiB VMEM) and v7x (64 MiB VMEM).
_VMEM_LIMIT = 48 * 1024 * 1024


def _round_up(x, m):
    return ((x + m - 1) // m) * m


def _choose_tiles(n, target_tn=1536):
    """(nb, tn, n_padded): tn multiple of 128 (lane-dense stores), nb >= 2 so
    both v7x TensorCores get work when the N axis is marked parallel."""
    nb = max(2, pl.cdiv(n, target_tn))
    tn = _round_up(pl.cdiv(n, nb), 128)
    return nb, tn, nb * tn


def _gelu_exact(x):
    # PyTorch nn.GELU() default (approximate='none'): 0.5*x*(1+erf(x/sqrt(2)))
    return 0.5 * x * (1.0 + lax.erf(x * (1.0 / math.sqrt(2.0))))


# ---------------------------------------------------------------------------
# Single Linear (+ optional GELU): used for the first (in->H) and last
# (H->out) layers.  Full batch + full (padded) K per block; only the output
# features are tiled, so the weight matrix is streamed column-block by
# column-block with no K grid axis and no accumulator epilogue.
# ---------------------------------------------------------------------------
def _linear_kernel(x_ref, w_ref, b_ref, o_ref, *, apply_gelu):
    # x_ref: (Mp, Kp) bf16 activations, resident across the grid.
    # w_ref: (Kp, tn) bf16 weight column block (streamed from HBM).
    # b_ref: (1, tn)  f32 bias slice.
    # o_ref: (Mp, tn) output block.
    y = jnp.dot(x_ref[...], w_ref[...], preferred_element_type=jnp.float32)
    y = y + b_ref[...]
    if apply_gelu:
        y = _gelu_exact(y)
    o_ref[...] = y.astype(o_ref.dtype)


def _linear_call(xp, wp, bp, *, nb, tn, apply_gelu, out_dtype):
    Mp, Kp = xp.shape
    Np = nb * tn
    assert wp.shape == (Kp, Np) and bp.shape == (1, Np)
    out_itemsize = jnp.dtype(out_dtype).itemsize
    cost = pl.CostEstimate(
        flops=int(2 * Mp * Kp * Np),
        transcendentals=int(Mp * Np if apply_gelu else 0),
        bytes_accessed=int(
            xp.size * xp.dtype.itemsize
            + wp.size * wp.dtype.itemsize
            + bp.size * bp.dtype.itemsize
            + Mp * Np * out_itemsize
        ),
    )
    return pl.pallas_call(
        functools.partial(_linear_kernel, apply_gelu=apply_gelu),
        out_shape=jax.ShapeDtypeStruct((Mp, Np), out_dtype),
        grid_spec=pltpu.PrefetchScalarGridSpec(
            num_scalar_prefetch=0,
            grid=(nb,),
            in_specs=[
                pl.BlockSpec((Mp, Kp), lambda j: (0, 0)),   # activations resident
                pl.BlockSpec((Kp, tn), lambda j: (0, j)),   # weight column block
                pl.BlockSpec((1, tn), lambda j: (0, j)),    # bias slice
            ],
            out_specs=pl.BlockSpec((Mp, tn), lambda j: (0, j)),
        ),
        compiler_params=pltpu.CompilerParams(
            dimension_semantics=("parallel",),   # v7x: both TCs stream half of W
            vmem_limit_bytes=_VMEM_LIMIT,
        ),
        cost_estimate=cost,
    )(xp, wp, bp)


# ---------------------------------------------------------------------------
# Fused stack of L identical hidden Linear(H,H)+GELU layers.
# grid = (L, nb); weights are stacked (L, Hp, Hp) and streamed; the activation
# is carried across layers in two VMEM scratch buffers (ping-pong by layer
# parity).  Column blocks of the carried activation are stacked on the leading
# (untiled) scratch axis so all stores/loads use static or whole-tile indices.
# ---------------------------------------------------------------------------
def _fused_hidden_kernel(x_ref, w_ref, b_ref, o_ref, act0_ref, act1_ref, *, nb, tn):
    # x_ref:  (Mp, Hp)  bf16 input activation (resident; read only at step 0).
    # w_ref:  (Hp, tn)  bf16 weight column block of hidden layer l.
    # b_ref:  (1, tn)   f32 bias slice of layer l.
    # o_ref:  (Mp, tn)  bf16 output block; only layer L-1's writes survive.
    # act{0,1}_ref: (nb, Mp, tn) f32 carried activation (ping-pong).
    l = pl.program_id(0)
    j = pl.program_id(1)

    @pl.when((l == 0) & (j == 0))
    def _seed():  # copy the kernel input into the carried activation, once
        for jj in range(nb):  # static unroll
            act0_ref[jj] = x_ref[:, jj * tn:(jj + 1) * tn].astype(jnp.float32)

    def step(src_ref, dst_ref):
        acc = jnp.zeros(o_ref.shape, jnp.float32)
        for jj in range(nb):  # static unroll over K blocks of the reduction
            xb = src_ref[jj].astype(jnp.bfloat16)      # (Mp, tn)
            wb = w_ref[jj * tn:(jj + 1) * tn, :]       # (tn, tn), static slice
            acc = acc + jnp.dot(xb, wb, preferred_element_type=jnp.float32)
        y = _gelu_exact(acc + b_ref[...])
        dst_ref[j] = y                                  # carry f32 activation
        o_ref[...] = y.astype(o_ref.dtype)

    @pl.when(l % 2 == 0)
    def _even():
        step(act0_ref, act1_ref)

    @pl.when(l % 2 == 1)
    def _odd():
        step(act1_ref, act0_ref)


def _fused_hidden_call(xp, w_stack, b_stack, *, nb, tn):
    Mp, Hp = xp.shape
    L = w_stack.shape[0]
    assert Hp == nb * tn
    assert w_stack.shape == (L, Hp, Hp) and b_stack.shape == (L, 1, Hp)
    cost = pl.CostEstimate(
        flops=int(2 * L * Mp * Hp * Hp),
        transcendentals=int(L * Mp * Hp),
        bytes_accessed=int(
            w_stack.size * w_stack.dtype.itemsize
            + b_stack.size * b_stack.dtype.itemsize
            + xp.size * xp.dtype.itemsize
            + Mp * Hp * 2
        ),
    )
    return pl.pallas_call(
        functools.partial(_fused_hidden_kernel, nb=nb, tn=tn),
        out_shape=jax.ShapeDtypeStruct((Mp, Hp), jnp.bfloat16),
        grid_spec=pltpu.PrefetchScalarGridSpec(
            num_scalar_prefetch=0,
            grid=(L, nb),
            in_specs=[
                pl.BlockSpec((Mp, Hp), lambda l, j: (0, 0)),           # resident input
                pl.BlockSpec((None, Hp, tn), lambda l, j: (l, 0, j)),  # weight block
                pl.BlockSpec((None, 1, tn), lambda l, j: (l, 0, j)),   # bias block
            ],
            out_specs=pl.BlockSpec((Mp, tn), lambda l, j: (0, j)),
            scratch_shapes=[
                pltpu.VMEM((nb, Mp, tn), jnp.float32),   # ping
                pltpu.VMEM((nb, Mp, tn), jnp.float32),   # pong
            ],
        ),
        compiler_params=pltpu.CompilerParams(
            # Carried VMEM activation is per-TensorCore -> no megacore split here.
            dimension_semantics=("arbitrary", "arbitrary"),
            vmem_limit_bytes=_VMEM_LIMIT,
        ),
        cost_estimate=cost,
    )(xp, w_stack, b_stack)


# ---------------------------------------------------------------------------
# One-time weight preparation + forward pass.
# ---------------------------------------------------------------------------
def init_params(key, in_dim, hidden_dim, out_dim, dtype=jnp.float32):
    """Deterministic synthetic weights matching the classifier's layer shapes."""
    dims = [in_dim] + [hidden_dim] * 6 + [out_dim]
    params = []
    for li in range(len(dims) - 1):
        key, kw, kb = jax.random.split(key, 3)
        bound = 1.0 / math.sqrt(dims[li])
        w = jax.random.uniform(kw, (dims[li], dims[li + 1]), dtype=dtype,
                               minval=-bound, maxval=bound)
        b = jax.random.uniform(kb, (dims[li + 1],), dtype=dtype,
                               minval=-bound, maxval=bound)
        params.append((w, b))
    return params


def prepare_params(params, *, target_tn=1536):
    """One-time: pad weights/biases to TPU-friendly shapes, cast weights to
    bf16, stack the identical hidden layers.  Done outside the forward pass so
    each forward only streams the final bf16 weights from HBM."""
    assert len(params) >= 3
    in_dim, hidden = params[0][0].shape
    out_dim = params[-1][0].shape[1]
    for w, b in params[1:-1]:
        assert w.shape == (hidden, hidden) and b.shape == (hidden,)
    assert params[-1][0].shape[0] == hidden

    k0p = _round_up(in_dim, 128)
    nb_h, tn_h, hp = _choose_tiles(hidden, target_tn)
    nb_o, tn_o, op = _choose_tiles(out_dim, target_tn)

    w0, b0 = params[0]
    wl, bl = params[-1]
    hidden_layers = params[1:-1]

    return {
        "in_dim": in_dim, "hidden": hidden, "out_dim": out_dim,
        "k0p": k0p, "hp": hp, "op": op,
        "nb_h": nb_h, "tn_h": tn_h, "nb_o": nb_o, "tn_o": tn_o,
        "w0": jnp.pad(w0, ((0, k0p - in_dim), (0, hp - hidden))).astype(jnp.bfloat16),
        "b0": jnp.pad(b0, (0, hp - hidden)).reshape(1, hp).astype(jnp.float32),
        "w_hidden": jnp.stack(
            [jnp.pad(w, ((0, hp - hidden), (0, hp - hidden))) for w, _ in hidden_layers]
        ).astype(jnp.bfloat16),
        "b_hidden": jnp.stack(
            [jnp.pad(b, (0, hp - hidden)).reshape(1, hp) for _, b in hidden_layers]
        ).astype(jnp.float32),
        "wl": jnp.pad(wl, ((0, hp - hidden), (0, op - out_dim))).astype(jnp.bfloat16),
        "bl": jnp.pad(bl, (0, op - out_dim)).reshape(1, op).astype(jnp.float32),
    }


def face_recognizer_forward(x, prep):
    """Pallas implementation of FaceRecognizer.forward (eval mode).
    Dropout(0.5) is identity at inference; softmax belongs to predict(), not forward()."""
    m, k = x.shape
    assert k == prep["in_dim"]
    mp = _round_up(max(m, 8), 8)
    xp = jnp.pad(x, ((0, mp - m), (0, prep["k0p"] - k))).astype(jnp.bfloat16)

    # Layer 0: Linear(in, hidden) + GELU
    h = _linear_call(xp, prep["w0"], prep["b0"], nb=prep["nb_h"], tn=prep["tn_h"],
                     apply_gelu=True, out_dtype=jnp.bfloat16)
    # Layers 1..5: fused Linear(hidden, hidden)+GELU stack (one pallas_call)
    h = _fused_hidden_call(h, prep["w_hidden"], prep["b_hidden"],
                           nb=prep["nb_h"], tn=prep["tn_h"])
    # Last layer: Linear(hidden, out), no activation
    y = _linear_call(h, prep["wl"], prep["bl"], nb=prep["nb_o"], tn=prep["tn_o"],
                     apply_gelu=False, out_dtype=jnp.float32)
    return y[:m, :prep["out_dim"]]


if __name__ == "__main__":
    # Scaled-down, deliberately non-aligned shapes exercising the padding path
    # (real module: batch small, in=2622, hidden=5000, out=features_count).
    BATCH, IN_DIM, HIDDEN_DIM, OUT_DIM = 3, 300, 400, 250

    key = jax.random.PRNGKey(0)
    key, kx = jax.random.split(key)
    x = jax.random.normal(kx, (BATCH, IN_DIM), dtype=jnp.float32)
    params = init_params(key, IN_DIM, HIDDEN_DIM, OUT_DIM)

    prep = prepare_params(params)          # one-time weight pad + bf16 cast
    out = face_recognizer_forward(x, prep)
    jax.block_until_ready(out)

    # Reference: identical math / quantization points (bf16 at each matmul
    # input, f32 accumulation + f32 bias + exact-erf GELU, f32 carried).
    ref = x
    for li, (w, b) in enumerate(params):
        ref = jnp.dot(ref.astype(jnp.bfloat16), w.astype(jnp.bfloat16),
                      preferred_element_type=jnp.float32) + b.astype(jnp.float32)
        if li != len(params) - 1:
            ref = _gelu_exact(ref)
    jax.block_until_ready(ref)

    assert out.shape == (BATCH, OUT_DIM)
    assert out.dtype == jnp.float32
    max_err = float(jnp.max(jnp.abs(out - ref)))
    assert jnp.allclose(out, ref, atol=1e-2, rtol=1e-2), max_err

    print("KERNEL_OK")
</pallas_src>

<mosaic_0001>
module attributes {stable_mosaic.version = 11 : i64} {
  func.func @_linear_kernel(%arg0: i32, %arg1: memref<8x384xbf16, #tpu.memory_space<vmem>>, %arg2: memref<384x256xbf16, #tpu.memory_space<vmem>>, %arg3: memref<1x256xf32, #tpu.memory_space<vmem>>, %arg4: memref<8x256xbf16, #tpu.memory_space<vmem>>) attributes {dimension_semantics = [#tpu.dimension_semantics<parallel>], iteration_bounds = array<i64: 2>, scalar_prefetch = 0 : i64, scratch_operands = 0 : i64, tpu.core_type = #tpu.core_type<tc>, window_params = [{pipeline_mode = #tpu.pipeline_mode<synchronous>, transform_indices = @transform_0, window_bounds = array<i64: 8, 384>}, {transform_indices = @transform_1, window_bounds = array<i64: 384, 256>}, {transform_indices = @transform_2, window_bounds = array<i64: 1, 256>}, {transform_indices = @transform_3, window_bounds = array<i64: 8, 256>}]} {
    %c0 = arith.constant 0 : index
    %c0_0 = arith.constant 0 : index
    %0 = vector.load %arg1[%c0, %c0_0] : memref<8x384xbf16, #tpu.memory_space<vmem>>, vector<8x384xbf16>
    %c0_1 = arith.constant 0 : index
    %c0_2 = arith.constant 0 : index
    %1 = vector.load %arg2[%c0_1, %c0_2] : memref<384x256xbf16, #tpu.memory_space<vmem>>, vector<384x256xbf16>
    %cst = arith.constant dense<0.000000e+00> : vector<8x256xf32>
    %2 = tpu.matmul %0, %1, %cst {dimension_numbers = #tpu.dot_dimension_numbers<[1], [0], [0], [1], [0, 0, 1, 1], [], []>} : vector<8x384xbf16>, vector<384x256xbf16>, vector<8x256xf32> -> vector<8x256xf32>
    %c0_3 = arith.constant 0 : index
    %c0_4 = arith.constant 0 : index
    %3 = vector.load %arg3[%c0_3, %c0_4] : memref<1x256xf32, #tpu.memory_space<vmem>>, vector<1x256xf32>
    %4 = vector.broadcast %3 : vector<1x256xf32> to vector<8x256xf32>
    %5 = arith.addf %2, %4 : vector<8x256xf32>
    %cst_5 = arith.constant 5.000000e-01 : f32
    %6 = vector.broadcast %cst_5 : f32 to vector<8x256xf32>
    %7 = arith.mulf %6, %5 : vector<8x256xf32>
    %cst_6 = arith.constant 0.707106769 : f32
    %8 = vector.broadcast %cst_6 : f32 to vector<8x256xf32>
    %9 = arith.mulf %5, %8 : vector<8x256xf32>
    %10 = math.erf %9 : vector<8x256xf32>
    %cst_7 = arith.constant 1.000000e+00 : f32
    %11 = vector.broadcast %cst_7 : f32 to vector<8x256xf32>
    %12 = arith.addf %11, %10 : vector<8x256xf32>
    %13 = arith.mulf %7, %12 : vector<8x256xf32>
    %14 = arith.truncf %13 : vector<8x256xf32> to vector<8x256xbf16>
    %c0_8 = arith.constant 0 : index
    %c0_9 = arith.constant 0 : index
    %15 = vector.load %arg4[%c0_8, %c0_9] : memref<8x256xbf16, #tpu.memory_space<vmem>>, vector<8x256xbf16>
    tpu.vector_store %arg4[%c0_8, %c0_9], %14 {strides = array<i32>} : memref<8x256xbf16, #tpu.memory_space<vmem>>, vector<8x256xbf16>,
    return
  }
  func.func @transform_0(%arg0: i32) -> (i32, i32) {
    %c0_i32 = arith.constant 0 : i32
    %c0_i32_0 = arith.constant 0 : i32
    %c0_i32_1 = arith.constant 0 : i32
    return %c0_i32, %c0_i32_0 : i32, i32
  }
  func.func @transform_1(%arg0: i32) -> (i32, i32) {
    %c0_i32 = arith.constant 0 : i32
    %c0_i32_0 = arith.constant 0 : i32
    return %c0_i32, %arg0 : i32, i32
  }
  func.func @transform_2(%arg0: i32) -> (i32, i32) {
    %c0_i32 = arith.constant 0 : i32
    %c0_i32_0 = arith.constant 0 : i32
    return %c0_i32, %arg0 : i32, i32
  }
  func.func @transform_3(%arg0: i32) -> (i32, i32) {
    %c0_i32 = arith.constant 0 : i32
    %c0_i32_0 = arith.constant 0 : i32
    return %c0_i32, %arg0 : i32, i32
  }
}

</mosaic_0001>

<bundles_post_ra>
// kernel: tpu_custom_call.1
= control target key start
LH: loop header
LB: loop body
LE: loop exit
PB: predicated region body
PF: predicated region fallthrough
CT: control target
= control target key end

     0   :  { %s1652_s0 = inlined_call_operand.hbm [shape: bf16[8,384], index: 0, kind: input, shape index: {}]   ;;  %s1653_s1 = inlined_call_operand.hbm [shape: bf16[384,512], index: 1, kind: input, shape index: {}]   ;;  %s1654_s2 = inlined_call_operand.hbm [shape: f32[1,512], index: 2, kind: input, shape index: {}]   ;;  %s1655_s3 = inlined_call_operand.hbm [shape: bf16[8,512], index: 3, kind: output, shape index: {}]  }
   0x1   :  { %1656 = sst [smem:[#allocation12_spill]] %s1652_s0 }
   0x2   :  { %8 = vsyncpa [#allocation3], 0 }
   0x3   :  { %9 = vsyncpa [#allocation6], 0 }
   0x4   :  { %11 = vsyncpa [#allocation6 + $0x1], 0 }
   0x5   :  { %12 = vsyncpa [#allocation4], 0 }
   0x6   :  { %14 = vsyncpa [#allocation4 + $0x1], 0  ;;  %s1357_s12 = smov 0   ;;  %s1359_s13 = smov 0  }
   0x7   :  { %s1361_s14 = smov 0   ;;  %s1363_s15 = smov 0  }
   0x8 LB: > { %s1378_s16 = sadd.s32 1, %s1331_s15   ;;  %s48_s17 = sadd.s32 1, %s1327_s14  ;;  %s1331_s15 = sphi %s1363_s15, %s1667_s15   ;;  %s1327_s14 = sphi %s1361_s14, %s1666_s14   ;;  %s1323_s13 = sphi %s1359_s13, %s1665_s13   ;;  %s1319_s12 = sphi %s1357_s12, %s1664_s12  }
   0x9   : > { %s45_s18 = ssub.s32 %s1331_s15, %s1378_s16  ;;  %p55_p0 = scmp.ne.s32.totalorder %s1327_s14, %s1323_s13 }
   0xa   : > { %p46_p1 = scmp.eq.s32.totalorder %s45_s18, 0  ;;  %p56_p2 = scmp.eq.s32.totalorder %s1331_s15, 0 }
   0xb   : > { %p1128_p4 = scmp.lt.s32.totalorder %s1331_s15, 2  ;;  %s149_s20 = sand.u32 1, %s1331_s15  }
   0xc   : > { %s1389_s19 = scalar_select %p46_p1, %s1327_s14, %s48_s17  }
   0xd   : > { %p57_p5 = por %p56_p2, %p55_p0  ;;  %s151_s21 = sand.u32 1, %s1327_s14  }
   0xe   : > { %s1100_s22 = smul.u32 384, %s151_s21  ;;  %s1050_s23 = sshll.u32 %s1331_s15, 3 }
   0xf   : > { %s158_s26 = scalar_lea.hbm %s1653_s1, %s1050_s23  ;;  %p1402_p6 = pnand %p1128_p4, %p57_p5 }
  0x10   : > { %s159_s28 = sshll.u32 %s158_s26, 4  ;;  %s153_s29 = scalar_lea.vmem [#allocation5], %s1100_s22  ;;  %s160_s28 = int_to_ptr.hbm [resolvable:$true] %s159_s28 }
  0x11   : > { %s161_s30 = sshll.u32 %s153_s29, 4  ;;  %s1406_s4 = scalar_lea.sflag [#allocation6], %s149_s20  ;;  %s162_s30 = int_to_ptr.vmem [resolvable:$true] %s161_s30 }
  0x12   : > { %s1171_s5 = sshra.s32 %s160_s28, 4  ;;  %p1175_p8 = pneg %p1402_p6  ;;  %s1172_s5 = int_to_ptr.hbm [resolvable:$true] %s1171_s5 }
  0x13   : > { %s1173_s6 = scalar_lea.hbm %s1172_s5, 384  ;;  %s1178_s9 = scalar_lea.hbm %s1653_s1, 768 }
  0x14   : > { %p1174_p7 = scmp.ne.s32.totalorder %s1172_s5, %s1173_s6  ;;  %p1179_p11 = scmp.lt.s32.totalorder %s1172_s5, %s1653_s1 }
  0x15   : > { %p1180_p12 = scmp.lt.s32.totalorder %s1178_s9, %s1173_s6 }
  0x16   : > { %p1176_p9 = pnand %p1175_p8, %p1174_p7 }
  0x17   : > { %p1181_p13 = por %p1180_p12, %p1179_p11 }
  0x18   : > { %p1177_p10 = pneg %p1176_p9 }
  0x1a   : > { %p1182_p1 = pnand %p1181_p13, %p1177_p10 }
  0x1c   : > { %1185 = shalt.err (!%p1182_p1)
}
  0x1d   : > { %s1333_s17 = smov 256   ;;  %s1334_s18 = smov 128  }
  0x1e   : > { %s1335_s20 = smov 8   ;;  %s1423_s22 = sadd.s32 4294967295, %s1331_s15  }
  0x1f   : > { %1119 = dma.hbm_to_vmem [thread:$0]  (!%p1402_p6), %s160_s28, 6144, %s162_s30, %s1406_s4, %s1333_s17, %s1334_s18, %s1335_s20  }
  0x20   : > { %s839_s23 = sadd.s32 4294967294, %s1331_s15   ;;  %p61_p2 = scmp.ne.s32.totalorder %s1323_s13, %s1319_s12 }
  0x21   : > { %p62_p4 = scmp.eq.s32.totalorder %s1423_s22, 0  ;;  %p111_p5 = scmp.eq.s32.totalorder %s1423_s22, 1 }
  0x22   : > { %p117_p7 = scmp.eq.s32.totalorder %s839_s23, 1  ;;  %p840_p9 = scmp.ge.s32.totalorder %s1331_s15, 1 }
  0x23   : > { %p1433_p10 = por %p62_p4, %p61_p2  ;;  %p1440_p11 = por %p111_p5, %p55_p0 }
  0x24   : > { %p1444_p12 = por %p117_p7, %p61_p2  ;;  %p124_p13 = scmp.lt.s32.totalorder %s1331_s15, 3 }
  0x25   : > { %s1661_s0 = sld [smem:[#allocation12_spill]]  ;;  %s845_s6 = sshll.u32 %s151_s21, 1 }
  0x26   : > { %p1452_p1 = pnand %p840_p9, %p124_p13  ;;  %s1336_s7 = smov [#allocation2]  }
  0x27   : > { %s138_s8 = sshll.u32 %s1336_s7, 4  ;;  %s846_s9 = sshll.u32 %s1331_s15, 1  ;;  %s139_s8 = int_to_ptr.vmem [resolvable:$true] %s138_s8 }
  0x28   : > { %p1112_p0 = pneg %p1452_p1  ;;  %s179_s17 = scalar_lea.hbm %s1654_s2, %s846_s9 }
  0x29   : > { %s175_s18 = scalar_lea.vmem [#allocation7], %s845_s6  ;;  %s181_s23 = sshll.u32 %s179_s17, 4  ;;  %s182_s23 = int_to_ptr.hbm [resolvable:$true] %s181_s23 }
  0x2a   : > { %p1113_p2 = pnand %p1112_p0, %p62_p4  ;;  %s183_s20 = sshll.u32 %s175_s18, 4  ;;  %s184_s20 = int_to_ptr.vmem [resolvable:$true] %s183_s20 }
  0x2b   : > { %s136_s30 = sshll.u32 %s1661_s0, 4  ;;  %s1231_s21 = sshra.s32 %s182_s23, 4  ;;  %s137_s30 = int_to_ptr.hbm [resolvable:$true] %s136_s30  ;;  %s1232_s21 = int_to_ptr.hbm [resolvable:$true] %s1231_s21 }
  0x2c   : > { %1115 = dma.hbm_to_vmem [thread:$0]  (!%p1113_p2), %s137_s30, 192, %s139_s8, [#allocation3]  }
  0x2d   : > { %s1233_s28 = scalar_lea.hbm %s1232_s21, 2  ;;  %s1238_s0 = scalar_lea.hbm %s1654_s2, 4 }
  0x2e   : > { %p1234_p5 = scmp.ne.s32.totalorder %s1232_s21, %s1233_s28  ;;  %p1239_p13 = scmp.lt.s32.totalorder %s1232_s21, %s1654_s2 }
  0x2f   : > { %p1240_p0 = scmp.lt.s32.totalorder %s1238_s0, %s1233_s28 }
  0x30   : > { %p1236_p7 = pnand %p1234_p5, %p1175_p8 }
  0x31   : > { %p1241_p2 = por %p1240_p0, %p1239_p13 }
  0x32   : > { %p1237_p9 = pneg %p1236_p7 }
  0x34   : > { %p1242_p3 = pnand %p1241_p2, %p1237_p9 }
  0x36   : > { %1245 = shalt.err (!%p1242_p3)
}
  0x37   : > { %1122 = dma.hbm_to_vmem [thread:$0]  (!%p1402_p6), %s182_s23, 32, %s184_s20, %s1406_s4  }
  0x38   : > { %192 = sbr.rel (%p1452_p1) target bundleno = 319 (0x13f), region = 32 }
  0x3d   : > { %1306 = dma.done.wait (%p62_p4), [#allocation3], 192  }
  0x3e   : > { %1308 = vsyncadd (%p62_p4), [#allocation3], 4294967104  ;;  %s199_s0 = sand.u32 1, %s1423_s22   ;;  %s1486_s30 = sand.u32 1, %s1323_s13  }
  0x3f   : > { %s1101_s6 = smul.u32 384, %s1486_s30  ;;  %s200_s27 = scalar_lea.sflag [#allocation6], %s199_s0 }
  0x41   : > { %s1489_s8 = scalar_lea.vmem [#allocation5], %s1101_s6 }
  0x42   : > { %1310 = dma.done.wait (%p1433_p10), %s200_s27, 6176  }
  0x43   : > { %1312 = vsyncadd (%p1433_p10), %s200_s27, 4294961120  ;;  %v909_v0 = vld [vmem:[%s1489_s8 + $0x70] sm:$0xf]  ;;  %v1066_v1 = vld [vmem:[%s1489_s8 + $0x74] sm:$0xf0]  ;;  %s849_s4 = sshll.u32 %s1486_s30, 1 }
  0x44   : > { %v973_v2 = vld [vmem:[%s1489_s8 + $0xf0] sm:$0xf]  ;;  %v910_v3 = vor.u32 %v1066_v1, %v909_v0  ;;  %v1082_v4 = vld [vmem:[%s1489_s8 + $0xf4] sm:$0xf0]  ;;  %v901_v9 = vld [vmem:[%s1489_s8 + $0x60] sm:$0xf] }
  0x45   : > { %v1037_v5 = vld [vmem:[%s1489_s8 + $0x170] sm:$0xf]  ;;  %v1098_v6 = vld [vmem:[%s1489_s8 + $0x174] sm:$0xf0]  ;;  %v974_v7 = vor.u32 %v1082_v4, %v973_v2  ;;  %v1064_v10 = vld [vmem:[%s1489_s8 + $0x64] sm:$0xf0] }
  0x46   : > { %v1038_v8 = vor.u32 %v1098_v6, %v1037_v5  ;;  %v965_v11 = vld [vmem:[%s1489_s8 + $0xe0] sm:$0xf]  ;;  %552 = vmatpush.bf16.msra.mxu0 %v910_v3  ;;  %v902_v12 = vor.u32 %v1064_v10, %v901_v9  ;;  %v1080_v13 = vld [vmem:[%s1489_s8 + $0xe4] sm:$0xf0]  ;;  %v893_v18 = vld [vmem:[%s1489_s8 + $0x50] sm:$0xf] }
  0x47   : > { %v1029_v14 = vld [vmem:[%s1489_s8 + $0x160] sm:$0xf]  ;;  %v1096_v15 = vld [vmem:[%s1489_s8 + $0x164] sm:$0xf0]  ;;  %565 = vmatpush.bf16.msra.mxu1 %v974_v7  ;;  %v966_v16 = vor.u32 %v1080_v13, %v965_v11  ;;  %v1062_v19 = vld [vmem:[%s1489_s8 + $0x54] sm:$0xf0] }
  0x48   : > { %578 = vmatpush.bf16.msra.mxu2 %v1038_v8  ;;  %v1030_v17 = vor.u32 %v1096_v15, %v1029_v14  ;;  %v957_v20 = vld [vmem:[%s1489_s8 + $0xd0] sm:$0xf]  ;;  %v1078_v21 = vld [vmem:[%s1489_s8 + $0xd4] sm:$0xf0]  ;;  %v894_v24 = vor.u32 %v1062_v19, %v893_v18  ;;  %v885_v25 = vld [vmem:[%s1489_s8 + $0x40] sm:$0xf] }
  0x49   : > { %v1021_v22 = vld [vmem:[%s1489_s8 + $0x150] sm:$0xf]  ;;  %v1094_v23 = vld [vmem:[%s1489_s8 + $0x154] sm:$0xf0]  ;;  %v1060_v26 = vld [vmem:[%s1489_s8 + $0x44] sm:$0xf0]  ;;  %v958_v27 = vor.u32 %v1078_v21, %v957_v20 }
  0x4a   : > { %553 = vmatpush.bf16.msra.mxu0 %v902_v12  ;;  %v1022_v28 = vor.u32 %v1094_v23, %v1021_v22  ;;  %v949_v29 = vld [vmem:[%s1489_s8 + $0xc0] sm:$0xf]  ;;  %v1065_v30 = vld [vmem:[%s1489_s8 + $0x74] sm:$0xf]  ;;  %v911_v31 = vld [vmem:[%s1489_s8 + $0x78] sm:$0xf0]  ;;  %v886_v37 = vor.u32 %v1060_v26, %v885_v25 }
  0x4b   : > { %566 = vmatpush.bf16.msra.mxu1 %v966_v16  ;;  %v1076_v32 = vld [vmem:[%s1489_s8 + $0xc4] sm:$0xf0]  ;;  %v1013_v33 = vld [vmem:[%s1489_s8 + $0x140] sm:$0xf]  ;;  %v914_v35 = vor.u32 %v1065_v30, %v911_v31  ;;  %v1063_v36 = vld [vmem:[%s1489_s8 + $0x64] sm:$0xf] }
  0x4c   : > { %579 = vmatpush.bf16.msra.mxu2 %v1030_v17  ;;  %v1092_v34 = vld [vmem:[%s1489_s8 + $0x144] sm:$0xf0]  ;;  %v877_v38 = vld [vmem:[%s1489_s8 + $0x30] sm:$0xf]  ;;  %v1058_v39 = vld [vmem:[%s1489_s8 + $0x34] sm:$0xf0]  ;;  %v950_v41 = vor.u32 %v1076_v32, %v949_v29 }
  0x4d   : > { %591 = vmatpush.bf16.msra.mxu3 %v914_v35  ;;  %v903_v40 = vld [vmem:[%s1489_s8 + $0x68] sm:$0xf0]  ;;  %v1014_v42 = vor.u32 %v1092_v34, %v1013_v33  ;;  %v941_v43 = vld [vmem:[%s1489_s8 + $0xb0] sm:$0xf]  ;;  %v1074_v44 = vld [vmem:[%s1489_s8 + $0xb4] sm:$0xf0]  ;;  %v878_v50 = vor.u32 %v1058_v39, %v877_v38 }
  0x4e   : > { %554 = vmatpush.bf16.msra.mxu0 %v894_v24  ;;  %v1005_v45 = vld [vmem:[%s1489_s8 + $0x130] sm:$0xf]  ;;  %v906_v46 = vor.u32 %v1063_v36, %v903_v40  ;;  %v1090_v47 = vld [vmem:[%s1489_s8 + $0x134] sm:$0xf0]  ;;  %v1061_v48 = vld [vmem:[%s1489_s8 + $0x54] sm:$0xf]  ;;  %v942_v54 = vor.u32 %v1074_v44, %v941_v43 }
  0x4f   : > { %567 = vmatpush.bf16.msra.mxu1 %v958_v27  ;;  %v895_v49 = vld [vmem:[%s1489_s8 + $0x58] sm:$0xf0]  ;;  %v869_v51 = vld [vmem:[%s1489_s8 + $0x20] sm:$0xf]  ;;  %v1056_v52 = vld [vmem:[%s1489_s8 + $0x24] sm:$0xf0]  ;;  %v1006_v55 = vor.u32 %v1090_v47, %v1005_v45 }
  0x50   : > { %580 = vmatpush.bf16.msra.mxu2 %v1022_v28  ;;  %v898_v53 = vor.u32 %v1061_v48, %v895_v49  ;;  %v933_v56 = vld [vmem:[%s1489_s8 + $0xa0] sm:$0xf]  ;;  %v1059_v57 = vld [vmem:[%s1489_s8 + $0x44] sm:$0xf]  ;;  %v887_v58 = vld [vmem:[%s1489_s8 + $0x48] sm:$0xf0]  ;;  %v870_v62 = vor.u32 %v1056_v52, %v869_v51 }
  0x51   : > { %592 = vmatpush.bf16.msra.mxu3 %v906_v46  ;;  %v1072_v59 = vld [vmem:[%s1489_s8 + $0xa4] sm:$0xf0]  ;;  %v997_v60 = vld [vmem:[%s1489_s8 + $0x120] sm:$0xf]  ;;  %v861_v63 = vld [vmem:[%s1489_s8 + $0x10] sm:$0xf]  ;;  %v890_v1 = vor.u32 %v1059_v57, %v887_v58 }
  0x52   : > { %555 = vmatpush.bf16.msra.mxu0 %v886_v37  ;;  %v1088_v61 = vld [vmem:[%s1489_s8 + $0x124] sm:$0xf0]  ;;  %v1054_v0 = vld [vmem:[%s1489_s8 + $0x14] sm:$0xf0]  ;;  %v934_v2 = vor.u32 %v1072_v59, %v933_v56  ;;  %v925_v4 = vld [vmem:[%s1489_s8 + $0x90] sm:$0xf] }
  0x53   : > { %568 = vmatpush.bf16.msra.mxu1 %v950_v41  ;;  %v998_v3 = vor.u32 %v1088_v61, %v997_v60  ;;  %v1057_v5 = vld [vmem:[%s1489_s8 + $0x34] sm:$0xf]  ;;  %v879_v6 = vld [vmem:[%s1489_s8 + $0x38] sm:$0xf0]  ;;  %v1070_v7 = vld [vmem:[%s1489_s8 + $0x94] sm:$0xf0]  ;;  %v862_v12 = vor.u32 %v1054_v0, %v861_v63 }
  0x54   : > { %581 = vmatpush.bf16.msra.mxu2 %v1014_v42  ;;  %v989_v8 = vld [vmem:[%s1489_s8 + $0x110] sm:$0xf]  ;;  %v1086_v9 = vld [vmem:[%s1489_s8 + $0x114] sm:$0xf0]  ;;  %v853_v10 = vld [vmem:[%s1489_s8] sm:$0xf]  ;;  %v882_v15 = vor.u32 %v1057_v5, %v879_v6  ;;  %v926_v17 = vor.u32 %v1070_v7, %v925_v4 }
  0x55   : > { %593 = vmatpush.bf16.msra.mxu3 %v898_v53  ;;  %v1052_v11 = vld [vmem:[%s1489_s8 + $0x4] sm:$0xf0]  ;;  %v917_v13 = vld [vmem:[%s1489_s8 + $0x80] sm:$0xf]  ;;  %v245_v16 = vld [vmem:[#allocation2] sm:$0xff]  ;;  %v990_v18 = vor.u32 %v1086_v9, %v989_v8  ;;  %s213_s24 = scalar_lea.vmem [#allocation7], %s849_s4 }
  0x56   : > { %556 = vmatpush.bf16.msra.mxu0 %v878_v50  ;;  %v1068_v14 = vld [vmem:[%s1489_s8 + $0x84] sm:$0xf0]  ;;  %v246_v19 = vld [vmem:[#allocation2 + $0x8] sm:$0xf]  ;;  %v1055_v20 = vld [vmem:[%s1489_s8 + $0x24] sm:$0xf]  ;;  %v303_v28 = vunpack.c.l.b16 %v245_v16  ;;  %v854_v29 = vor.u32 %v1052_v11, %v853_v10  ;;  %v304_v32 = vunpack.c.h.b16 %v245_v16 }
  0x57   : > { %569 = vmatpush.bf16.msra.mxu1 %v942_v54  ;;  %v871_v21 = vld [vmem:[%s1489_s8 + $0x28] sm:$0xf0]  ;;  %v981_v22 = vld [vmem:[%s1489_s8 + $0x100] sm:$0xf]  ;;  %v1084_v23 = vld [vmem:[%s1489_s8 + $0x104] sm:$0xf0]  ;;  %v305_v30 = vunpack.c.l.b16 %v246_v19  ;;  %v918_v33 = vor.u32 %v1068_v14, %v917_v13 }
  0x58   : > { %582 = vmatpush.bf16.msra.mxu2 %v1006_v55  ;;  %v1081_v24 = vld [vmem:[%s1489_s8 + $0xf4] sm:$0xf]  ;;  %v975_v25 = vld [vmem:[%s1489_s8 + $0xf8] sm:$0xf0]  ;;  %v874_v31 = vor.u32 %v1055_v20, %v871_v21  ;;  %v982_v34 = vor.u32 %v1084_v23, %v981_v22  ;;  %v1079_v37 = vld [vmem:[%s1489_s8 + $0xe4] sm:$0xf]  ;;  %v306_v40 = vpack.c.b16 %v303_v28, %v303_v28  ;;  %v1567_v45 = vpack.c.b16 %v304_v32, %v304_v32 }
  0x59   : > { %594 = vmatpush.bf16.msra.mxu3 %v890_v1  ;;  %v1097_v26 = vld [vmem:[%s1489_s8 + $0x174] sm:$0xf]  ;;  %v1039_v27 = vld [vmem:[%s1489_s8 + $0x178] sm:$0xf0]  ;;  %v978_v35 = vor.u32 %v1081_v24, %v975_v25  ;;  %v967_v41 = vld [vmem:[%s1489_s8 + $0xe8] sm:$0xf0]  ;;  %v1565_v44 = vpack.c.b16 %v305_v30, %v305_v30 }
  0x5a   : > { %557 = vmatpush.bf16.msra.mxu0 %v870_v62  ;;  %v1042_v36 = vor.u32 %v1097_v26, %v1039_v27  ;;  %v1053_v38 = vld [vmem:[%s1489_s8 + $0x14] sm:$0xf]  ;;  %v863_v39 = vld [vmem:[%s1489_s8 + $0x18] sm:$0xf0]  ;;  %v1095_v42 = vld [vmem:[%s1489_s8 + $0x164] sm:$0xf]  ;;  %v970_v47 = vor.u32 %v1079_v37, %v967_v41 }
  0x5b   : > { %570 = vmatpush.bf16.msra.mxu1 %v934_v2  ;;  %v1031_v43 = vld [vmem:[%s1489_s8 + $0x168] sm:$0xf0]  ;;  %v866_v46 = vor.u32 %v1053_v38, %v863_v39  ;;  %v1077_v49 = vld [vmem:[%s1489_s8 + $0xd4] sm:$0xf]  ;;  %v1051_v50 = vld [vmem:[%s1489_s8 + $0x4] sm:$0xf] }
  0x5c   : > { %583 = vmatpush.bf16.msra.mxu2 %v998_v3  ;;  %v1034_v48 = vor.u32 %v1095_v42, %v1031_v43  ;;  %v855_v51 = vld [vmem:[%s1489_s8 + $0x8] sm:$0xf0]  ;;  %v959_v52 = vld [vmem:[%s1489_s8 + $0xd8] sm:$0xf0]  ;;  %v1093_v53 = vld [vmem:[%s1489_s8 + $0x154] sm:$0xf] }
  0x5d   : > { %595 = vmatpush.bf16.msra.mxu3 %v882_v15  ;;  %v1023_v54 = vld [vmem:[%s1489_s8 + $0x158] sm:$0xf0]  ;;  %v858_v55 = vor.u32 %v1051_v50, %v855_v51  ;;  %v962_v56 = vor.u32 %v1077_v49, %v959_v52  ;;  %v1075_v58 = vld [vmem:[%s1489_s8 + $0xc4] sm:$0xf]  ;;  %v951_v59 = vld [vmem:[%s1489_s8 + $0xc8] sm:$0xf0] }
  0x5e   : > { %558 = vmatpush.bf16.msra.mxu0 %v862_v12  ;;  %v1026_v57 = vor.u32 %v1093_v53, %v1023_v54  ;;  %v1091_v60 = vld [vmem:[%s1489_s8 + $0x144] sm:$0xf]  ;;  %v1015_v61 = vld [vmem:[%s1489_s8 + $0x148] sm:$0xf0]  ;;  %v954_v62 = vor.u32 %v1075_v58, %v951_v59  ;;  %v1073_v0 = vld [vmem:[%s1489_s8 + $0xb4] sm:$0xf] }
  0x5f   : > { %571 = vmatpush.bf16.msra.mxu1 %v926_v17  ;;  %v1018_v63 = vor.u32 %v1091_v60, %v1015_v61  ;;  %v943_v1 = vld [vmem:[%s1489_s8 + $0xb8] sm:$0xf0]  ;;  %v1089_v2 = vld [vmem:[%s1489_s8 + $0x134] sm:$0xf]  ;;  %v1071_v6 = vld [vmem:[%s1489_s8 + $0xa4] sm:$0xf] }
  0x60   : > { %584 = vmatpush.bf16.msra.mxu2 %v990_v18  ;;  %v1007_v3 = vld [vmem:[%s1489_s8 + $0x138] sm:$0xf0]  ;;  %v946_v4 = vor.u32 %v1073_v0, %v943_v1  ;;  %v935_v7 = vld [vmem:[%s1489_s8 + $0xa8] sm:$0xf0]  ;;  %v1087_v8 = vld [vmem:[%s1489_s8 + $0x124] sm:$0xf] }
  0x61   : > { %596 = vmatpush.bf16.msra.mxu3 %v874_v31  ;;  %v1010_v5 = vor.u32 %v1089_v2, %v1007_v3  ;;  %v999_v9 = vld [vmem:[%s1489_s8 + $0x128] sm:$0xf0]  ;;  %v938_v10 = vor.u32 %v1071_v6, %v935_v7  ;;  %v1069_v12 = vld [vmem:[%s1489_s8 + $0x94] sm:$0xf]  ;;  %v927_v13 = vld [vmem:[%s1489_s8 + $0x98] sm:$0xf0] }
  0x62   : > { %559 = vmatpush.bf16.msra.mxu0 %v854_v29  ;;  %v1002_v11 = vor.u32 %v1087_v8, %v999_v9  ;;  %v1085_v14 = vld [vmem:[%s1489_s8 + $0x114] sm:$0xf]  ;;  %v991_v15 = vld [vmem:[%s1489_s8 + $0x118] sm:$0xf0]  ;;  %v930_v16 = vor.u32 %v1069_v12, %v927_v13  ;;  %v1067_v18 = vld [vmem:[%s1489_s8 + $0x84] sm:$0xf] }
  0x63   : > { %572 = vmatpush.bf16.msra.mxu1 %v918_v33  ;;  %v994_v17 = vor.u32 %v1085_v14, %v991_v15  ;;  %v919_v19 = vld [vmem:[%s1489_s8 + $0x88] sm:$0xf0]  ;;  %v1083_v20 = vld [vmem:[%s1489_s8 + $0x104] sm:$0xf]  ;;  %v295_v24 = vld [vmem:[%s213_s24] sm:$0x3] }
  0x64   : > { %585 = vmatpush.bf16.msra.mxu2 %v982_v34  ;;  %v983_v21 = vld [vmem:[%s1489_s8 + $0x108] sm:$0xf0]  ;;  %v922_v22 = vor.u32 %v1067_v18, %v919_v19  ;;  %v297_v25 = vperm.slane %v295_v24, 0  ;;  %v298_v43 = vperm.slane %v295_v24, 1  ;;  %s850_s5 = sshll.u32 %s1486_s30, 3  ;;  %s1099_s11 = sshll.u32 %s1423_s22, 3 }
  0x65   : > { %560 = vmatmul.bf16.vlgmr.msra.gmra.mxu0 %v306_v40  ;;  %597 = vmatpush.bf16.msra.mxu3 %v866_v46  ;;  %v986_v23 = vor.u32 %v1083_v20, %v983_v21  ;;  %s732_s20 = scalar_lea.hbm %s1655_s3, %s1099_s11  ;;  %s241_s23 = scalar_lea.vmem [#allocation8], %s850_s5 }
  0x66   : > { %604 = vmatpush.bf16.msrb.mxu0 %v978_v35  ;;  %573 = vmatmul.bf16.vlgmr.msra.gmra.mxu1 %v1567_v45  ;;  %s734_s21 = sshll.u32 %s241_s23, 4  ;;  %s736_s28 = sshll.u32 %s732_s20, 4  ;;  %s735_s21 = int_to_ptr.vmem [resolvable:$true] %s734_s21  ;;  %s737_s28 = int_to_ptr.hbm [resolvable:$true] %s736_s28 }
  0x67   : > { %617 = vmatpush.bf16.msrb.mxu1 %v1042_v36  ;;  %586 = vmatmul.bf16.vlgmr.msra.gmra.mxu2 %v1565_v44  ;;  %s721_s22 = scalar_lea.sflag [#allocation4], %s1486_s30  ;;  %s1275_s29 = sshra.s32 %s737_s28, 4  ;;  %s1276_s29 = int_to_ptr.hbm [resolvable:$true] %s1275_s29 }
  0x68   : > { %s1277_s7 = scalar_lea.hbm %s1276_s29, 8  ;;  %s1281_s0 = scalar_lea.hbm %s1655_s3, 16 }
  0x69   : > { %598 = vmatpush.bf16.msra.mxu3 %v858_v55  ;;  %p1278_p3 = scmp.ne.s32.totalorder %s1276_s29, %s1277_s7  ;;  %p1282_p4 = scmp.lt.s32.totalorder %s1276_s29, %s1655_s3 }
  0x6a   : > { %605 = vmatpush.bf16.msrb.mxu0 %v970_v47  ;;  %p1283_p10 = scmp.lt.s32.totalorder %s1281_s0, %s1277_s7 }
  0x6b   : > { %618 = vmatpush.bf16.msrb.mxu1 %v1034_v48  ;;  %p1279_p6 = pnand %p1278_p3, %p1440_p11 }
  0x6c   : > { %599 = vmatmul.bf16.vlgmr.msra.gmra.mxu3 %v306_v40  ;;  %p1284_p1 = por %p1283_p10, %p1282_p4 }
  0x6d   : > { %p1280_p8 = pneg %p1279_p6 }
  0x6e   : > { %606 = vmatpush.bf16.msrb.mxu0 %v962_v56 }
  0x6f   : > { %619 = vmatpush.bf16.msrb.mxu1 %v1026_v57  ;;  %p1285_p5 = pnand %p1284_p1, %p1280_p8 }
  0x72   : > { %607 = vmatpush.bf16.msrb.mxu0 %v954_v62 }
  0x73   : > { %620 = vmatpush.bf16.msrb.mxu1 %v1018_v63 }
  0x76   : > { %608 = vmatpush.bf16.msrb.mxu0 %v946_v4 }
  0x77   : > { %621 = vmatpush.bf16.msrb.mxu1 %v1010_v5 }
  0x7a   : > { %609 = vmatpush.bf16.msrb.mxu0 %v938_v10 }
  0x7b   : > { %622 = vmatpush.bf16.msrb.mxu1 %v1002_v11 }
  0x7e   : > { %610 = vmatpush.bf16.msrb.mxu0 %v930_v16 }
  0x7f   : > { %623 = vmatpush.bf16.msrb.mxu1 %v994_v17 }
  0x82   : > { %611 = vmatpush.bf16.msrb.mxu0 %v922_v22 }
  0x83   : > { %624 = vmatpush.bf16.msrb.mxu1 %v986_v23 }
  0x85   : > { %612 = vmatmul.bf16.vlgmr.msrb.gmra.mxu0 %v1567_v45 }
  0x86   : > { %625 = vmatmul.bf16.vlgmr.msrb.gmra.mxu1 %v1565_v44 }
  0xe2   : > { %v561_v26 = vpop.f32.mrf.mxu0 }
  0xe3   : > { %v562_v27 = vadd.f32 %v561_v26, %v297_v25  ;;  %v574_v28 = vpop.f32.mrf.mxu1 }
  0xe5   : > { %v575_v29 = vadd.f32 %v574_v28, %v562_v27 }
  0xea   : > { %v587_v30 = vpop.f32.mrf.mxu2  ;;  %v563_v32 = vpop.f32.mrf.mxu0 }
  0xeb   : > { %v1600_v31 = vadd.f32 %v587_v30, %v575_v29  ;;  %v576_v33 = vpop.f32.mrf.mxu1 }
  0xed   : > { %v1603_v34 = vmul.f32 0.70710677, %v1600_v31 }
  0xef   : > { %v634_v35 = vmul.f32 %v1603_v34, %v1603_v34  ;;  %v600_v37 = vpop.f32.mrf.mxu3 }
  0xf0   : > { %v601_v47 = vadd.f32 %v600_v37, %v298_v43 }
  0xf1   : > { %v635_v36 = vmin.f32 %v634_v35, 16.0 }
  0xf2   : > { %v589_v38 = vpop.f32.mrf.mxu2 }
  0xf3   : > { %v647_v39 = vmul.f32 3.8918573e-05, %v635_v36  ;;  %v636_v49 = vmul.f32 2.1237322e-06, %v635_v36 }
  0xf5   : > { %v648_v40 = vadd.f32 0.001143296, %v647_v39  ;;  %v637_v55 = vadd.f32 0.00028619796, %v636_v49 }
  0xf7   : > { %v649_v41 = vmul.f32 %v648_v40, %v635_v36  ;;  %v602_v44 = vpop.f32.mrf.mxu3  ;;  %v638_v59 = vmul.f32 %v637_v55, %v635_v36  ;;  %v630_v55 = vmul.f32 0.5, %v1600_v31 }
  0xf9   : > { %v650_v42 = vadd.f32 0.014752088, %v649_v41  ;;  %v639_v0 = vadd.f32 0.0036580483, %v638_v59 }
  0xfb   : > { %v651_v45 = vmul.f32 %v650_v42, %v635_v36  ;;  %v640_v5 = vmul.f32 %v639_v0, %v635_v36 }
  0xfd   : > { %v652_v46 = vadd.f32 0.112945676, %v651_v45  ;;  %v641_v11 = vadd.f32 0.05243302, %v640_v5 }
  0xff   : > { %v653_v48 = vmul.f32 %v652_v46, %v635_v36  ;;  %v642_v16 = vmul.f32 %v641_v11, %v635_v36 }
 0x101   : > { %v654_v50 = vadd.f32 0.4994258, %v653_v48  ;;  %v643_v21 = vadd.f32 0.18741608, %v642_v16 }
 0x102   : > { %v613_v51 = vpop.f32.mrf.mxu0 }
 0x103   : > { %v626_v52 = vpop.f32.mrf.mxu1  ;;  %v614_v53 = vadd.f32 %v613_v51, %v601_v47  ;;  %v655_v54 = vmul.f32 %v654_v50, %v635_v36  ;;  %v644_v26 = vmul.f32 %v643_v21, %v635_v36 }
 0x105   : > { %v1607_v56 = vadd.f32 %v626_v52, %v614_v53  ;;  %v656_v58 = vadd.f32 1.0, %v655_v54  ;;  %v645_v32 = vadd.f32 1.1283791, %v644_v26 }
 0x107   : > { %v1610_v57 = vmul.f32 0.70710677, %v1607_v56  ;;  %1167 = vrcp.f32 %v656_v58  ;;  %v668_v28 = vand.u32 2147483648, %v656_v58  ;;  %vm662_vm1 = vweird.f32 %v656_v58 }
 0x108   : > { %v666_v29 = vand.u32 2147483647, %v656_v58  ;;  %v646_v41 = vmul.f32 %v645_v32, %v1603_v34 }
 0x109   : > { %v674_v60 = vmul.f32 %v1610_v57, %v1610_v57  ;;  %v669_v35 = vor.u32 1.1754944e-38, %v668_v28 }
 0x10a   : > { %v615_v61 = vpop.f32.mrf.mxu0  ;;  %vm667_vm3 = vcmp.eq.f32.partialorder %v666_v29, 8.507059e+37 }
 0x10b   : > { %v628_v62 = vpop.f32.mrf.mxu1  ;;  %v675_v63 = vmin.f32 %v674_v60, 16.0 }
 0x10d   : > { %v676_v1 = vmul.f32 2.1237322e-06, %v675_v63  ;;  %v687_v2 = vmul.f32 3.8918573e-05, %v675_v63  ;;  %v1168_v8 = vpop.eup %1167 }
 0x10e   : > { %v658_v12 = vmul.f32 %v1168_v8, %v656_v58  ;;  %vm663_vm0 = vweird.f32 %v1168_v8  ;;  %v631_v58 = vmul.f32 0.5, %v1607_v56 }
 0x10f   : > { %v677_v3 = vadd.f32 0.00028619796, %v676_v1  ;;  %v688_v4 = vadd.f32 0.001143296, %v687_v2  ;;  %vm664_vm2 = vmor %vm662_vm1, %vm663_vm0 }
 0x110   : > { %v659_v17 = vsub.f32 1.0, %v658_v12 }
 0x111   : > { %v678_v6 = vmul.f32 %v677_v3, %v675_v63  ;;  %v689_v7 = vmul.f32 %v688_v4, %v675_v63 }
 0x112   : > { %v660_v22 = vmul.f32 %v1168_v8, %v659_v17 }
 0x113   : > { %v690_v9 = vadd.f32 0.014752088, %v689_v7  ;;  %v679_v10 = vadd.f32 0.0036580483, %v678_v6 }
 0x114   : > { %v661_v27 = vadd.f32 %v1168_v8, %v660_v22 }
 0x115   : > { %v691_v13 = vmul.f32 %v690_v9, %v675_v63  ;;  %v680_v15 = vmul.f32 %v679_v10, %v675_v63 }
 0x116   : > { %v665_v33 = vsel %vm664_vm2, %v1168_v8, %v661_v27 }
 0x117   : > { %v692_v14 = vadd.f32 0.112945676, %v691_v13  ;;  %v681_v20 = vadd.f32 0.05243302, %v680_v15  ;;  %v670_v38 = vsel %vm667_vm3, %v669_v35, %v665_v33 }
 0x118   : > { %v671_v36 = vmul.f32 %v670_v38, %v646_v41 }
 0x119   : > { %v693_v18 = vmul.f32 %v692_v14, %v675_v63  ;;  %v682_v25 = vmul.f32 %v681_v20, %v675_v63 }
 0x11a   : > { %v1043_v49 = vclamps-f32 %v671_v36, 1.0 }
 0x11b   : > { %v694_v19 = vadd.f32 0.4994258, %v693_v18  ;;  %v683_v30 = vadd.f32 0.18741608, %v682_v25 }
 0x11c   : > { %v714_v53 = vadd.f32 1.0, %v1043_v49 }
 0x11d   : > { %v695_v23 = vmul.f32 %v694_v19, %v675_v63  ;;  %v684_v39 = vmul.f32 %v683_v30, %v675_v63 }
 0x11f   : > { %v696_v24 = vadd.f32 1.0, %v695_v23  ;;  %v685_v44 = vadd.f32 1.1283791, %v684_v39 }
 0x121   : > { %1169 = vrcp.f32 %v696_v24  ;;  %v708_v43 = vand.u32 2147483648, %v696_v24  ;;  %v706_v46 = vand.u32 2147483647, %v696_v24  ;;  %vm702_vm5 = vweird.f32 %v696_v24 }
 0x122   : > { %v686_v50 = vmul.f32 %v685_v44, %v1610_v57  ;;  %v716_v57 = vmul.f32 %v714_v53, %v630_v55 }
 0x123   : > { %v709_v48 = vor.u32 1.1754944e-38, %v708_v43  ;;  %vm707_vm7 = vcmp.eq.f32.partialorder %v706_v46, 8.507059e+37 }
 0x127   : > { %v1170_v37 = vpop.eup %1169 }
 0x128   : > { %v698_v40 = vmul.f32 %v1170_v37, %v696_v24  ;;  %vm703_vm4 = vweird.f32 %v1170_v37 }
 0x129   : > { %vm704_vm6 = vmor %vm702_vm5, %vm703_vm4 }
 0x12a   : > { %v699_v42 = vsub.f32 1.0, %v698_v40 }
 0x12c   : > { %v700_v45 = vmul.f32 %v1170_v37, %v699_v42 }
 0x12e   : > { %v701_v47 = vadd.f32 %v1170_v37, %v700_v45 }
 0x130   : > { %v705_v51 = vsel %vm704_vm6, %v1170_v37, %v701_v47 }
 0x131   : > { %v710_v52 = vsel %vm707_vm7, %v709_v48, %v705_v51 }
 0x132   : > { %v711_v34 = vmul.f32 %v710_v52, %v686_v50 }
 0x134   : > { %v1044_v54 = vclamps-f32 %v711_v34, 1.0 }
 0x136   : > { %v715_v59 = vadd.f32 1.0, %v1044_v54 }
 0x138   : > { %v717_v60 = vmul.f32 %v715_v59, %v631_v58 }
 0x13a   : > { %v718_v61 = vpack.c.bf16 %v717_v60, %v716_v57 }
 0x13c   : > { %719 = vst [vmem:[%s241_s23] sm:$0xff] %v718_v61 }
 0x13d   : > { %1288 = shalt.err (!%p1285_p5)
}
 0x13e   : > { %1110 = dma.vmem_to_hbm [thread:$0]  (%p1440_p11), %s735_s21, 128, %s737_s28, %s721_s22  }
 0x13f PF: > { %s748_s30 = sand.u32 1, %s1319_s12   ;;  %p1663_p7 = scmp.ge.s32.totalorder %s1331_s15, 2 }
 0x140   : > { %s749_s8 = scalar_lea.sflag [#allocation4], %s748_s30 }
 0x141   : > { %p1124_p9 = pnand %p1663_p7, %p1444_p12 }
 0x143   : > { %p1125_p13 = pneg %p1124_p9 }
 0x145   : > { %1314 = dma.done.wait (%p1125_p13), %s749_s8, 128  }
 0x146   : > { %1316 = vsyncadd (%p1125_p13), %s749_s8, 4294967168  ;;  %p17_p0 = scmp.ge.s32.totalorder %s1378_s16, 4   ;;  %s1664_s12 = smov %s1323_s13 }
 0x147   : > { %s1665_s13 = smov %s1327_s14  ;;  %s1666_s14 = smov %s1389_s19 }
 0x148   : > { %s1667_s15 = smov %s1378_s16  ;;  %19 = sbr.rel (!%p17_p0) target bundleno = 8 (0x8), region = 93 }
 0x14d   :  { %755 = vsyncpa [#allocation3], 1 }
 0x14e   :  { %757 = vsyncpa [#allocation3 + $0x1], 1 }
 0x14f   :  { %758 = vsyncpa [#allocation6], 1 }
 0x150   :  { %760 = vsyncpa [#allocation6 + $0x1], 1 }
 0x151   :  { %761 = vsyncpa [#allocation4], 1 }
 0x152   :  { %763 = vsyncpa [#allocation4 + $0x1], 1 }

</bundles_post_ra>
